<compile_context>
chip_gen: v6e
topology: v6e:2x2x1
jax: 0.10.0
libtpu: 0.0.40
codegen_flags: <defaults>
</compile_context>

<pallas_src>
import jax
import jax.numpy as jnp
from jax.experimental import pallas as pl
from jax.experimental.pallas import tpu as pltpu


def _round_up(x, m):
    return ((x + m - 1) // m) * m


def _vmem_limit(nbytes):
    # generous headroom; floor at the common default scoped limit, cap at 128 MiB.
    return int(min(128 * 1024 * 1024, max(32 * 1024 * 1024, 2 * int(nbytes))))


def _invariant_spec(block_shape, index_map):
    """BlockSpec for a grid-invariant block, single-buffered (halves weight VMEM)."""
    try:
        return pl.BlockSpec(block_shape, index_map, pipeline_mode=pl.Buffered(1))
    except Exception:  # older jax without pipeline_mode: fall back to default buffering
        return pl.BlockSpec(block_shape, index_map)


# --------------------------------------------------------------------------------------
# Weight padding helpers: per-gate lane padding (H -> Hp multiple of 128) and row padding.
# --------------------------------------------------------------------------------------
def _pad_gate_cols(w, H, Hp):
    """(d, 4H) -> (d, 4*Hp): each i|f|g|o gate block zero-padded to Hp lanes."""
    if Hp == H:
        return w
    d = w.shape[0]
    return jnp.pad(w.reshape(d, 4, H), ((0, 0), (0, 0), (0, Hp - H))).reshape(d, 4 * Hp)


def _pad_gate_bias(b, H, Hp):
    if Hp == H:
        return b
    return jnp.pad(b.reshape(4, H), ((0, 0), (0, Hp - H))).reshape(4 * Hp)


def _pad_rows(w, rp):
    r = w.shape[0]
    if rp == r:
        return w
    return jnp.pad(w, ((0, rp - r), (0, 0)))


# --------------------------------------------------------------------------------------
# Kernel 1: tiled (M, D) @ (D, N) + bias (bf16 operands, f32 accumulate).
# Used for the hoisted per-layer input projections and the all-timesteps FC.
# --------------------------------------------------------------------------------------
def linear_kernel(x_ref, w_ref, b_ref, o_ref):
    x = x_ref[...].astype(jnp.bfloat16)          # bf16 MXU operands
    o_ref[...] = (
        jnp.dot(x, w_ref[...], preferred_element_type=jnp.float32) + b_ref[...]
    ).astype(o_ref.dtype)


def run_linear(x2d, w_t, bias, tm=512, tn=512):
    """x2d: (M, D) f32/bf16.  w_t: (D, N) bf16.  bias: (N,) f32.  ->  (M, N) f32."""
    M, D = x2d.shape
    N = w_t.shape[1]

    tile_m = M if M <= tm else tm
    m_pad = _round_up(M, tile_m)
    if m_pad != M:
        x2d = jnp.pad(x2d, ((0, m_pad - M), (0, 0)))
    tile_n = N if N <= tn else tn
    n_pad = _round_up(N, tile_n)
    if n_pad != N:
        w_t = jnp.pad(w_t, ((0, 0), (0, n_pad - N)))
        bias = jnp.pad(bias, ((0, n_pad - N),))
    gm, gn = m_pad // tile_m, n_pad // tile_n

    # TODO(synk): for very large D add a K grid axis with an f32 VMEM accumulator.
    if gn == 1:  # weight/bias blocks are grid-invariant -> single-buffer them
        w_spec = _invariant_spec((D, tile_n), lambda m, n: (0, n))
        b_spec = _invariant_spec((1, tile_n), lambda m, n: (0, n))
    else:
        w_spec = pl.BlockSpec((D, tile_n), lambda m, n: (0, n))
        b_spec = pl.BlockSpec((1, tile_n), lambda m, n: (0, n))

    x_bytes = jnp.dtype(x2d.dtype).itemsize
    vmem = (2 * tile_m * D * x_bytes            # x block (double-buffered)
            + (2 if gn > 1 else 1) * D * tile_n * 2   # bf16 weight block
            + 2 * tile_n * 4                    # bias
            + 2 * tile_m * tile_n * 4)          # f32 output block (double-buffered)

    out = pl.pallas_call(
        linear_kernel,
        out_shape=jax.ShapeDtypeStruct((m_pad, n_pad), jnp.float32),
        grid=(gm, gn),
        in_specs=[pl.BlockSpec((tile_m, D), lambda m, n: (m, 0)), w_spec, b_spec],
        out_specs=pl.BlockSpec((tile_m, tile_n), lambda m, n: (m, n)),
        compiler_params=pltpu.CompilerParams(
            dimension_semantics=("parallel", "parallel"),
            vmem_limit_bytes=_vmem_limit(vmem)),
    )(x2d, w_t, bias.reshape(1, n_pad))
    if m_pad != M or n_pad != N:
        out = out[:M, :N]
    return out


# --------------------------------------------------------------------------------------
# Kernel 2: LSTM recurrence.  gates_x precomputed; per timestep only h_prev @ W_hh.
# One grid step handles `chunk` timesteps.  H here is the lane-padded hidden size.
# --------------------------------------------------------------------------------------
def _lstm_cell(gates_x, h_prev, c_prev, whh_bf16, H):
    gates = gates_x + jnp.dot(h_prev.astype(jnp.bfloat16), whh_bf16,
                              preferred_element_type=jnp.float32)
    i = jax.nn.sigmoid(gates[:, 0 * H:1 * H])   # lane-aligned slices (H % 128 == 0)
    f = jax.nn.sigmoid(gates[:, 1 * H:2 * H])
    g = jnp.tanh(gates[:, 2 * H:3 * H])
    o = jax.nn.sigmoid(gates[:, 3 * H:4 * H])
    c_new = f * c_prev + i * g                  # f32 state update (v5e-safe)
    h_new = o * jnp.tanh(c_new)
    return h_new, c_new


def make_lstm_seq_kernel(hidden, chunk, seq_len, padded_len):
    need_mask = padded_len != seq_len  # static: only trace masking when time is padded

    def kernel(gx_ref, whh_ref, out_ref, h_sc, c_sc):
        @pl.when(pl.program_id(0) == 0)
        def _():
            h_sc[...] = jnp.zeros_like(h_sc)
            c_sc[...] = jnp.zeros_like(c_sc)

        chunk_start = pl.program_id(0) * chunk
        whh = whh_ref[...]

        def body(t, carry):
            h_prev, c_prev = h_sc[...], c_sc[...]
            h_new, c_new = _lstm_cell(gx_ref[t], h_prev, c_prev, whh, hidden)
            if need_mask:
                valid = (chunk_start + t) < seq_len
                h_new = jnp.where(valid, h_new, h_prev)
                c_new = jnp.where(valid, c_new, c_prev)
            h_sc[...] = h_new
            c_sc[...] = c_new
            out_ref[t] = h_new.astype(out_ref.dtype)   # bf16, lane-dense writeback
            return carry

        jax.lax.fori_loop(0, chunk, body, 0, unroll=True)

    return kernel


def make_lstm_last_fc_kernel(hidden, chunk, seq_len, padded_len):
    """Recurrence without sequence writeback + final Linear fused on the last grid step."""
    need_mask = padded_len != seq_len

    def kernel(gx_ref, whh_ref, fcw_ref, fcb_ref, out_ref, h_sc, c_sc):
        @pl.when(pl.program_id(0) == 0)
        def _():
            h_sc[...] = jnp.zeros_like(h_sc)
            c_sc[...] = jnp.zeros_like(c_sc)

        chunk_start = pl.program_id(0) * chunk
        whh = whh_ref[...]

        def body(t, carry):
            h_prev, c_prev = h_sc[...], c_sc[...]
            h_new, c_new = _lstm_cell(gx_ref[t], h_prev, c_prev, whh, hidden)
            if need_mask:
                valid = (chunk_start + t) < seq_len
                h_new = jnp.where(valid, h_new, h_prev)
                c_new = jnp.where(valid, c_new, c_prev)
            h_sc[...] = h_new
            c_sc[...] = c_new
            return carry

        jax.lax.fori_loop(0, chunk, body, 0, unroll=True)

        @pl.when(pl.program_id(0) == pl.num_programs(0) - 1)
        def _():
            out_ref[...] = (
                jnp.dot(h_sc[...].astype(jnp.bfloat16), fcw_ref[...],
                        preferred_element_type=jnp.float32) + fcb_ref[...]
            ).astype(out_ref.dtype)

    return kernel


# --------------------------------------------------------------------------------------
# pallas_call wrappers for the recurrence
# --------------------------------------------------------------------------------------
def run_lstm_seq(gx, whh_bf, chunk, seq_len):
    """gx: (T_pad, B, 4H) f32 precomputed x@W_ih^T + bias.  Returns bf16 (T_pad, B, H)."""
    t_pad, B, G = gx.shape
    H = whh_bf.shape[0]
    kernel = make_lstm_seq_kernel(H, chunk, seq_len, t_pad)
    vmem = (2 * chunk * B * G * 4        # gx chunk (f32, double-buffered)
            + H * G * 2                  # W_hh (bf16, single-buffered)
            + 2 * chunk * B * H * 2      # bf16 output chunk (double-buffered)
            + 2 * B * H * 4)             # h/c carries
    return pl.pallas_call(
        kernel,
        out_shape=jax.ShapeDtypeStruct((t_pad, B, H), jnp.bfloat16),
        grid=(t_pad // chunk,),
        in_specs=[pl.BlockSpec((chunk, B, G), lambda s: (s, 0, 0)),
                  _invariant_spec((H, G), lambda s: (0, 0))],
        out_specs=pl.BlockSpec((chunk, B, H), lambda s: (s, 0, 0)),
        scratch_shapes=[pltpu.VMEM((B, H), jnp.float32),   # h carry (f32)
                        pltpu.VMEM((B, H), jnp.float32)],  # c carry (f32)
        compiler_params=pltpu.CompilerParams(
            dimension_semantics=("arbitrary",),
            vmem_limit_bytes=_vmem_limit(vmem)),
    )(gx, whh_bf)


def run_lstm_last_fc(gx, whh_bf, fc_w_pad, fc_b_pad, chunk, seq_len):
    """Last LSTM layer + fused FC on the final real timestep.  Returns f32 (B, N_pad)."""
    t_pad, B, G = gx.shape
    H = whh_bf.shape[0]
    N = fc_w_pad.shape[1]
    kernel = make_lstm_last_fc_kernel(H, chunk, seq_len, t_pad)
    vmem = (2 * chunk * B * G * 4 + H * G * 2 + H * N * 2 + N * 4
            + 2 * B * N * 4 + 2 * B * H * 4)
    return pl.pallas_call(
        kernel,
        out_shape=jax.ShapeDtypeStruct((B, N), jnp.float32),
        grid=(t_pad // chunk,),
        in_specs=[pl.BlockSpec((chunk, B, G), lambda s: (s, 0, 0)),
                  _invariant_spec((H, G), lambda s: (0, 0)),
                  _invariant_spec((H, N), lambda s: (0, 0)),
                  _invariant_spec((1, N), lambda s: (0, 0))],
        out_specs=pl.BlockSpec((B, N), lambda s: (0, 0)),
        scratch_shapes=[pltpu.VMEM((B, H), jnp.float32),
                        pltpu.VMEM((B, H), jnp.float32)],
        compiler_params=pltpu.CompilerParams(
            dimension_semantics=("arbitrary",),
            vmem_limit_bytes=_vmem_limit(vmem)),
    )(gx, whh_bf, fc_w_pad, fc_b_pad.reshape(1, N))


# --------------------------------------------------------------------------------------
# Module-equivalent wrapper (deterministic parameter init, like nn.LSTM's U(-k, k))
# --------------------------------------------------------------------------------------
class LSTMModelPallas:
    def __init__(self, input_dim, hidden_size, num_states, num_layers, key, time_chunk=16):
        self.hidden_size = hidden_size
        self.hidden_pad = _round_up(hidden_size, 128)    # lane-dense gates / hidden state
        self.num_states = num_states
        self.num_states_pad = _round_up(num_states, 128)
        self.n_layers = num_layers
        self.time_chunk = time_chunk                     # sweep {16, 32, 64} at real shapes
        H, Hp = hidden_size, self.hidden_pad
        k = 1.0 / jnp.sqrt(hidden_size)

        self.layers_ref = []   # unpadded bf16 weights (for the pure-JAX reference)
        self.layers = []       # lane/gate-padded bf16 kernel weights
        for layer in range(num_layers):
            d_in = input_dim if layer == 0 else H
            key, k1, k2, k3, k4 = jax.random.split(key, 5)
            # PyTorch shapes: weight_ih (4H, d_in), weight_hh (4H, H); stored transposed.
            wih_t = jax.random.uniform(k1, (d_in, 4 * H), jnp.float32, -k, k)
            whh_t = jax.random.uniform(k2, (H, 4 * H), jnp.float32, -k, k)
            b_ih = jax.random.uniform(k3, (4 * H,), jnp.float32, -k, k)
            b_hh = jax.random.uniform(k4, (4 * H,), jnp.float32, -k, k)
            b = b_ih + b_hh

            wih_bf = wih_t.astype(jnp.bfloat16)
            whh_bf = whh_t.astype(jnp.bfloat16)
            self.layers_ref.append((wih_bf, whh_bf, b))

            wih_pad = _pad_gate_cols(wih_bf, H, Hp)
            if layer > 0:                      # layer input is the padded hidden state
                wih_pad = _pad_rows(wih_pad, Hp)
            whh_pad = _pad_rows(_pad_gate_cols(whh_bf, H, Hp), Hp)
            b_pad = _pad_gate_bias(b, H, Hp)
            self.layers.append((wih_pad, whh_pad, b_pad))

        key, k5, k6 = jax.random.split(key, 3)
        fc_w = jax.random.uniform(k5, (H, num_states), jnp.float32, -k, k)
        fc_b = jax.random.uniform(k6, (num_states,), jnp.float32, -k, k)
        self.fc_w_bf = fc_w.astype(jnp.bfloat16)
        self.fc_b = fc_b
        Np = self.num_states_pad
        self.fc_w_pad = (jnp.zeros((Hp, Np), jnp.bfloat16)
                         .at[:H, :num_states].set(self.fc_w_bf))
        self.fc_b_pad = jnp.zeros((Np,), jnp.float32).at[:num_states].set(fc_b)

    def __call__(self, x, return_all_tsteps=False):
        # x: (B, T, D) batch-first; hidden state zero-init per call (save_hidden_state=False path).
        B, T, _ = x.shape
        Hp = self.hidden_pad
        Bp = _round_up(B, 8)                     # full-sublane batch
        chunk = max(1, min(self.time_chunk, T))
        t_pad = _round_up(T, chunk)

        h_seq = jnp.transpose(x, (1, 0, 2)).astype(jnp.float32)   # (T, B, D) time-major
        h_seq = jnp.pad(h_seq, ((0, t_pad - T), (0, Bp - B), (0, 0)))

        for li, (wih_pad, whh_pad, b_pad) in enumerate(self.layers):
            d_in = h_seq.shape[-1]
            # Hoisted input projection: one MXU-shaped matmul over all timesteps.
            gx = run_linear(h_seq.reshape(t_pad * Bp, d_in), wih_pad, b_pad)
            gx = gx.reshape(t_pad, Bp, 4 * Hp)
            is_last = li == self.n_layers - 1
            if is_last and not return_all_tsteps:
                out = run_lstm_last_fc(gx, whh_pad, self.fc_w_pad, self.fc_b_pad, chunk, T)
                return out[:B, :self.num_states]                  # (B, num_states) f32
            h_seq = run_lstm_seq(gx, whh_pad, chunk, T)           # bf16 (t_pad, Bp, Hp)

        # return_all_tsteps=True: tiled FC over every timestep.
        h2d = h_seq[:T].reshape(T * Bp, Hp)
        out = run_linear(h2d, self.fc_w_pad, self.fc_b_pad)       # (T*Bp, Np) f32
        out = out.reshape(T, Bp, self.num_states_pad)[:, :B, :self.num_states]
        return jnp.transpose(out, (1, 0, 2))                      # (B, T, num_states)


# --------------------------------------------------------------------------------------
# Pure-JAX reference (lax.scan) mirroring the kernels' bf16-operand / f32-accumulate math
# --------------------------------------------------------------------------------------
def lstm_ref(x_btd, layers_ref, fc_w_bf, fc_b, return_all=False):
    h_seq = jnp.transpose(x_btd, (1, 0, 2)).astype(jnp.float32)
    for wih_t, whh_t, b in layers_ref:
        H = whh_t.shape[0]
        B = h_seq.shape[1]

        def step(carry, xt, wih_t=wih_t, whh_t=whh_t, b=b, H=H):
            h, c = carry
            gates = (jnp.dot(xt.astype(jnp.bfloat16), wih_t, preferred_element_type=jnp.float32)
                     + jnp.dot(h.astype(jnp.bfloat16), whh_t, preferred_element_type=jnp.float32)
                     + b)
            i = jax.nn.sigmoid(gates[:, :H])
            f = jax.nn.sigmoid(gates[:, H:2 * H])
            g = jnp.tanh(gates[:, 2 * H:3 * H])
            o = jax.nn.sigmoid(gates[:, 3 * H:])
            c = f * c + i * g
            h = o * jnp.tanh(c)
            return (h, c), h

        init = (jnp.zeros((B, H), jnp.float32), jnp.zeros((B, H), jnp.float32))
        _, h_seq = jax.lax.scan(step, init, h_seq)

    if return_all:
        T, B, H = h_seq.shape
        out = (jnp.dot(h_seq.astype(jnp.bfloat16).reshape(T * B, H), fc_w_bf,
                       preferred_element_type=jnp.float32) + fc_b)
        return jnp.transpose(out.reshape(T, B, -1), (1, 0, 2))
    out = jnp.dot(h_seq[-1].astype(jnp.bfloat16), fc_w_bf,
                  preferred_element_type=jnp.float32) + fc_b
    return out


# --------------------------------------------------------------------------------------
if __name__ == "__main__":
    batch, seq, input_dim = 2, 8, 16
    hidden_size, num_states, num_layers = 32, 4, 2

    key = jax.random.PRNGKey(0)
    key, kx, kp = jax.random.split(key, 3)

    x = jax.random.normal(kx, (batch, seq, input_dim), jnp.float32)

    model = LSTMModelPallas(input_dim, hidden_size, num_states, num_layers, kp)

    out_last = jax.block_until_ready(model(x))                          # (B, num_states)
    out_all = jax.block_until_ready(model(x, return_all_tsteps=True))   # (B, T, num_states)

    ref_last = lstm_ref(x, model.layers_ref, model.fc_w_bf, model.fc_b, return_all=False)
    ref_all = lstm_ref(x, model.layers_ref, model.fc_w_bf, model.fc_b, return_all=True)

    assert out_last.shape == (batch, num_states), out_last.shape
    assert out_all.shape == (batch, seq, num_states), out_all.shape
    assert jnp.allclose(out_last, ref_last, atol=2e-3, rtol=2e-3), (
        f"last-step max abs err {jnp.max(jnp.abs(out_last - ref_last))}")
    assert jnp.allclose(out_all, ref_all, atol=2e-3, rtol=2e-3), (
        f"all-steps max abs err {jnp.max(jnp.abs(out_all - ref_all))}")

    print("KERNEL_OK")
</pallas_src>

<mosaic_0001>
module attributes {stable_mosaic.version = 11 : i64} {
  func.func @linear_kernel(%arg0: i32, %arg1: i32, %arg2: memref<64x16xf32, #tpu.memory_space<vmem>>, %arg3: memref<16x512xbf16, #tpu.memory_space<vmem>>, %arg4: memref<1x512xf32, #tpu.memory_space<vmem>>, %arg5: memref<64x512xf32, #tpu.memory_space<vmem>>) attributes {dimension_semantics = [#tpu.dimension_semantics<parallel>, #tpu.dimension_semantics<parallel>], iteration_bounds = array<i64: 1, 1>, scalar_prefetch = 0 : i64, scratch_operands = 0 : i64, tpu.core_type = #tpu.core_type<tc>, window_params = [{transform_indices = @transform_0, window_bounds = array<i64: 64, 16>}, {pipeline_mode = #tpu.pipeline_mode<synchronous>, transform_indices = @transform_1, window_bounds = array<i64: 16, 512>}, {pipeline_mode = #tpu.pipeline_mode<synchronous>, transform_indices = @transform_2, window_bounds = array<i64: 1, 512>}, {transform_indices = @transform_3, window_bounds = array<i64: 64, 512>}]} {
    %c0 = arith.constant 0 : index
    %c0_0 = arith.constant 0 : index
    %0 = vector.load %arg2[%c0, %c0_0] : memref<64x16xf32, #tpu.memory_space<vmem>>, vector<64x16xf32>
    %1 = arith.truncf %0 : vector<64x16xf32> to vector<64x16xbf16>
    %c0_1 = arith.constant 0 : index
    %c0_2 = arith.constant 0 : index
    %2 = vector.load %arg3[%c0_1, %c0_2] : memref<16x512xbf16, #tpu.memory_space<vmem>>, vector<16x512xbf16>
    %cst = arith.constant dense<0.000000e+00> : vector<64x512xf32>
    %3 = tpu.matmul %1, %2, %cst {dimension_numbers = #tpu.dot_dimension_numbers<[1], [0], [0], [1], [0, 0, 1, 1], [], []>} : vector<64x16xbf16>, vector<16x512xbf16>, vector<64x512xf32> -> vector<64x512xf32>
    %c0_3 = arith.constant 0 : index
    %c0_4 = arith.constant 0 : index
    %4 = vector.load %arg4[%c0_3, %c0_4] : memref<1x512xf32, #tpu.memory_space<vmem>>, vector<1x512xf32>
    %5 = vector.broadcast %4 : vector<1x512xf32> to vector<64x512xf32>
    %6 = arith.addf %3, %5 : vector<64x512xf32>
    %c0_5 = arith.constant 0 : index
    %c0_6 = arith.constant 0 : index
    %7 = vector.load %arg5[%c0_5, %c0_6] : memref<64x512xf32, #tpu.memory_space<vmem>>, vector<64x512xf32>
    tpu.vector_store %arg5[%c0_5, %c0_6], %6 {strides = array<i32>} : memref<64x512xf32, #tpu.memory_space<vmem>>, vector<64x512xf32>,
    return
  }
  func.func @transform_0(%arg0: i32, %arg1: i32) -> (i32, i32) {
    %c0_i32 = arith.constant 0 : i32
    %c0_i32_0 = arith.constant 0 : i32
    return %arg0, %c0_i32 : i32, i32
  }
  func.func @transform_1(%arg0: i32, %arg1: i32) -> (i32, i32) {
    %c0_i32 = arith.constant 0 : i32
    %c0_i32_0 = arith.constant 0 : i32
    return %c0_i32, %arg1 : i32, i32
  }
  func.func @transform_2(%arg0: i32, %arg1: i32) -> (i32, i32) {
    %c0_i32 = arith.constant 0 : i32
    %c0_i32_0 = arith.constant 0 : i32
    return %c0_i32, %arg1 : i32, i32
  }
  func.func @transform_3(%arg0: i32, %arg1: i32) -> (i32, i32) {
    %c0_i32 = arith.constant 0 : i32
    return %arg0, %arg1 : i32, i32
  }
}

</mosaic_0001>

<bundles_post_ra>
// kernel: tpu_custom_call.1
= control target key start
LH: loop header
LB: loop body
LE: loop exit
PB: predicated region body
PF: predicated region fallthrough
CT: control target
= control target key end

     0   :  { %v325_v2 = vmov 0   ;;  %vm74_vm0 = vcmask 130048   ;;  %s439_s0 = inlined_call_operand.vmem [shape: f32[64,16], index: 0, kind: input, shape index: {}]   ;;  %s440_s1 = inlined_call_operand.vmem [shape: bf16[16,512], index: 1, kind: input, shape index: {}]   ;;  %s441_s2 = inlined_call_operand.vmem [shape: f32[1,512], index: 2, kind: input, shape index: {}]   ;;  %s442_s3 = inlined_call_operand.hbm [shape: f32[64,512], index: 3, kind: output, shape index: {}]  }
   0x1   :  { %v297_v0 = vld [vmem:[%s440_s1 + $0x4] ss:$16 sps:$4 sm:$0xff]   ;;  %v299_v1 = vld [vmem:[%s440_s1 + $0xc] ss:$16 sps:$4 sm:$0xff]   ;;  %119 = vmatprep.mubr.bf16.mxu0 %v325_v2  ;;  %192 = vmatprep.mubr.bf16.mxu1 %v325_v2  ;;  %v301_v3 = vld [vmem:[%s440_s1] ss:$16 sps:$4 sm:$0xff]  }
   0x2   :  { %101 = vmatprep.subr.bf16.mxu0 %v297_v0  ;;  %v302_v4 = vld [vmem:[%s440_s1 + $0x8] ss:$16 sps:$4 sm:$0xff]   ;;  %v16_v5 = vld [vmem:[%s439_s0] sm:$0xff]  ;;  %174 = vmatprep.subr.bf16.mxu1 %v299_v1 }
   0x3   :  { %v17_v6 = vld [vmem:[%s439_s0 + $0x8] sm:$0xff]  ;;  %102 = vmatpush1.bf16.msra.mxu0 %v301_v3  ;;  %175 = vmatpush1.bf16.msra.mxu1 %v302_v4 }
   0x4   :  { %v24_v7 = vpack.c.bf16 %v17_v6, %v16_v5 }
   0x5   :  { %8 = vsyncpa [#allocation3], 0  ;;  %v18_v8 = vld [vmem:[%s439_s0 + $0x10] sm:$0xff]  ;;  %v19_v9 = vld [vmem:[%s439_s0 + $0x18] sm:$0xff]  ;;  %v34_v17 = vlaneseq }
   0x6   :  { %285 = vmatmul.mubr.msk.bf16.vlgmr.msra.gmra.mxu0 %vm74_vm0, %v24_v7  ;;  %289 = vmatmul.mubr.msk.bf16.vlgmr.msra.gmra.mxu1 %vm74_vm0, %v24_v7  ;;  %v25_v10 = vpack.c.bf16 %v19_v9, %v18_v8  ;;  %v20_v11 = vld [vmem:[%s439_s0 + $0x20] sm:$0xff]  ;;  %v21_v12 = vld [vmem:[%s439_s0 + $0x28] sm:$0xff]  ;;  %v22_v14 = vld [vmem:[%s439_s0 + $0x30] sm:$0xff] }
   0x7   :  { %129 = vmatprep.mubr.bf16.mxu0 %v325_v2  ;;  %202 = vmatprep.mubr.bf16.mxu1 %v325_v2  ;;  %v26_v13 = vpack.c.bf16 %v21_v12, %v20_v11  ;;  %v23_v15 = vld [vmem:[%s439_s0 + $0x38] sm:$0xff]  ;;  %v35_v18 = vshrl.u32 %v34_v17, 7  ;;  %v32_v21 = vld [vmem:[%s441_s2] sm:$0xf]  ;;  %s326_s0 = smov [#allocation2]  }
   0x8   :  { %v27_v16 = vpack.c.bf16 %v23_v15, %v22_v14  ;;  %s270_s2 = sshll.u32 %s326_s0, 4  ;;  %s271_s2 = int_to_ptr.vmem [resolvable:$true] %s270_s2 }
   0x9   :  { %v36_v19 = vsub.s32 0, %v35_v18  ;;  %v44_v20 = vsub.s32 2, %v35_v18  ;;  %v40_v22 = vsub.s32 1, %v35_v18  ;;  %v48_v23 = vsub.s32 3, %v35_v18  ;;  %s303_s10 = scalar_lea.vmem %s271_s2, 4096  ;;  %p308_p1 = scmp.lt.s32.totalorder %s271_s2, %s271_s2 }
   0xa   :  { %p304_p0 = scmp.ne.s32.totalorder %s271_s2, %s303_s10  ;;  %p309_p2 = scmp.lt.s32.totalorder %s303_s10, %s303_s10 }
   0xb   :  { %v396_v24 = vrot.slane %v32_v21, %v36_v19  ;;  %v398_v25 = vrot.slane %v32_v21, %v44_v20  ;;  %v400_v26 = vrot.slane %v32_v21, %v40_v22  ;;  %v402_v27 = vrot.slane %v32_v21, %v48_v23 }
   0xc   :  { %p310_p3 = por %p309_p2, %p308_p1 }
   0xe   :  { %286 = vmatmul.mubr.msk.bf16.gmra.mxu0 %vm74_vm0, %v25_v10  ;;  %290 = vmatmul.mubr.msk.bf16.gmra.mxu1 %vm74_vm0, %v25_v10  ;;  %p311_p4 = pnand %p310_p3, %p304_p0 }
   0xf   :  { %139 = vmatprep.mubr.bf16.mxu0 %v325_v2  ;;  %212 = vmatprep.mubr.bf16.mxu1 %v325_v2 }
  0x16   :  { %287 = vmatmul.mubr.msk.bf16.gmra.mxu0 %vm74_vm0, %v26_v13  ;;  %291 = vmatmul.mubr.msk.bf16.gmra.mxu1 %vm74_vm0, %v26_v13 }
  0x17   :  { %149 = vmatprep.mubr.bf16.mxu0 %v325_v2  ;;  %222 = vmatprep.mubr.bf16.mxu1 %v325_v2 }
  0x1e   :  { %288 = vmatmul.mubr.msk.bf16.gmra.mxu0 %vm74_vm0, %v27_v16  ;;  %292 = vmatmul.mubr.msk.bf16.gmra.mxu1 %vm74_vm0, %v27_v16 }
  0xc6   :  { %v121_v28 = vpop.f32.mrf.mxu0  ;;  %v194_v29 = vpop.f32.mrf.mxu1 }
  0xc7   :  { %v122_v30 = vadd.f32 %v121_v28, %v396_v24  ;;  %v195_v31 = vadd.f32 %v194_v29, %v398_v25 }
  0xc8   :  { %v123_v32 = vpop.f32.mrf.mxu0  ;;  %v196_v33 = vpop.f32.mrf.mxu1 }
  0xc9   :  { %233 = vst [vmem:[#allocation2] sm:$0xff] %v122_v30  ;;  %235 = vst [vmem:[#allocation2 + $0x10] sm:$0xff] %v195_v31  ;;  %v124_v34 = vadd.f32 %v123_v32, %v400_v26  ;;  %v197_v35 = vadd.f32 %v196_v33, %v402_v27 }
  0xca   :  { %v125_v36 = vpop.f32.mrf.mxu0  ;;  %v198_v37 = vpop.f32.mrf.mxu1 }
  0xcb   :  { %234 = vst [vmem:[#allocation2 + $0x8] sm:$0xff] %v124_v34  ;;  %236 = vst [vmem:[#allocation2 + $0x18] sm:$0xff] %v197_v35  ;;  %v126_v38 = vadd.f32 %v125_v36, %v396_v24  ;;  %v199_v39 = vadd.f32 %v198_v37, %v398_v25 }
  0xcc   :  { %v127_v40 = vpop.f32.mrf.mxu0  ;;  %v200_v41 = vpop.f32.mrf.mxu1 }
  0xcd   :  { %237 = vst [vmem:[#allocation2 + $0x20] sm:$0xff] %v126_v38  ;;  %239 = vst [vmem:[#allocation2 + $0x30] sm:$0xff] %v199_v39  ;;  %v128_v42 = vadd.f32 %v127_v40, %v400_v26  ;;  %v201_v43 = vadd.f32 %v200_v41, %v402_v27 }
  0xce   :  { %v131_v44 = vpop.f32.mrf.mxu0  ;;  %v204_v45 = vpop.f32.mrf.mxu1 }
  0xcf   :  { %238 = vst [vmem:[#allocation2 + $0x28] sm:$0xff] %v128_v42  ;;  %240 = vst [vmem:[#allocation2 + $0x38] sm:$0xff] %v201_v43  ;;  %v132_v46 = vadd.f32 %v131_v44, %v396_v24  ;;  %v205_v47 = vadd.f32 %v204_v45, %v398_v25 }
  0xd0   :  { %v133_v48 = vpop.f32.mrf.mxu0  ;;  %v206_v49 = vpop.f32.mrf.mxu1 }
  0xd1   :  { %241 = vst [vmem:[#allocation2 + $0x40] sm:$0xff] %v132_v46  ;;  %243 = vst [vmem:[#allocation2 + $0x50] sm:$0xff] %v205_v47  ;;  %v134_v50 = vadd.f32 %v133_v48, %v400_v26  ;;  %v207_v51 = vadd.f32 %v206_v49, %v402_v27 }
  0xd2   :  { %v135_v52 = vpop.f32.mrf.mxu0  ;;  %v208_v53 = vpop.f32.mrf.mxu1 }
  0xd3   :  { %242 = vst [vmem:[#allocation2 + $0x48] sm:$0xff] %v134_v50  ;;  %244 = vst [vmem:[#allocation2 + $0x58] sm:$0xff] %v207_v51  ;;  %v136_v54 = vadd.f32 %v135_v52, %v396_v24  ;;  %v209_v55 = vadd.f32 %v208_v53, %v398_v25 }
  0xd4   :  { %v137_v56 = vpop.f32.mrf.mxu0  ;;  %v210_v57 = vpop.f32.mrf.mxu1 }
  0xd5   :  { %245 = vst [vmem:[#allocation2 + $0x60] sm:$0xff] %v136_v54  ;;  %247 = vst [vmem:[#allocation2 + $0x70] sm:$0xff] %v209_v55  ;;  %v138_v58 = vadd.f32 %v137_v56, %v400_v26  ;;  %v211_v59 = vadd.f32 %v210_v57, %v402_v27 }
  0xd6   :  { %v141_v60 = vpop.f32.mrf.mxu0  ;;  %v214_v61 = vpop.f32.mrf.mxu1 }
  0xd7   :  { %246 = vst [vmem:[#allocation2 + $0x68] sm:$0xff] %v138_v58  ;;  %248 = vst [vmem:[#allocation2 + $0x78] sm:$0xff] %v211_v59  ;;  %v142_v62 = vadd.f32 %v141_v60, %v396_v24  ;;  %v215_v63 = vadd.f32 %v214_v61, %v398_v25 }
  0xd8   :  { %v143_v0 = vpop.f32.mrf.mxu0  ;;  %v216_v1 = vpop.f32.mrf.mxu1 }
  0xd9   :  { %249 = vst [vmem:[#allocation2 + $0x80] sm:$0xff] %v142_v62  ;;  %251 = vst [vmem:[#allocation2 + $0x90] sm:$0xff] %v215_v63  ;;  %v144_v2 = vadd.f32 %v143_v0, %v400_v26  ;;  %v217_v3 = vadd.f32 %v216_v1, %v402_v27 }
  0xda   :  { %v145_v4 = vpop.f32.mrf.mxu0  ;;  %v218_v5 = vpop.f32.mrf.mxu1 }
  0xdb   :  { %250 = vst [vmem:[#allocation2 + $0x88] sm:$0xff] %v144_v2  ;;  %252 = vst [vmem:[#allocation2 + $0x98] sm:$0xff] %v217_v3  ;;  %v146_v6 = vadd.f32 %v145_v4, %v396_v24  ;;  %v219_v7 = vadd.f32 %v218_v5, %v398_v25 }
  0xdc   :  { %v147_v8 = vpop.f32.mrf.mxu0  ;;  %v220_v9 = vpop.f32.mrf.mxu1 }
  0xdd   :  { %253 = vst [vmem:[#allocation2 + $0xa0] sm:$0xff] %v146_v6  ;;  %255 = vst [vmem:[#allocation2 + $0xb0] sm:$0xff] %v219_v7  ;;  %v148_v10 = vadd.f32 %v147_v8, %v400_v26  ;;  %v221_v11 = vadd.f32 %v220_v9, %v402_v27 }
  0xde   :  { %v151_v12 = vpop.f32.mrf.mxu0  ;;  %v224_v13 = vpop.f32.mrf.mxu1 }
  0xdf   :  { %254 = vst [vmem:[#allocation2 + $0xa8] sm:$0xff] %v148_v10  ;;  %256 = vst [vmem:[#allocation2 + $0xb8] sm:$0xff] %v221_v11  ;;  %v152_v14 = vadd.f32 %v151_v12, %v396_v24  ;;  %v225_v15 = vadd.f32 %v224_v13, %v398_v25 }
  0xe0   :  { %v153_v16 = vpop.f32.mrf.mxu0  ;;  %v226_v17 = vpop.f32.mrf.mxu1 }
  0xe1   :  { %257 = vst [vmem:[#allocation2 + $0xc0] sm:$0xff] %v152_v14  ;;  %259 = vst [vmem:[#allocation2 + $0xd0] sm:$0xff] %v225_v15  ;;  %v154_v18 = vadd.f32 %v153_v16, %v400_v26  ;;  %v227_v19 = vadd.f32 %v226_v17, %v402_v27 }
  0xe2   :  { %v155_v20 = vpop.f32.mrf.mxu0  ;;  %v228_v21 = vpop.f32.mrf.mxu1 }
  0xe3   :  { %258 = vst [vmem:[#allocation2 + $0xc8] sm:$0xff] %v154_v18  ;;  %260 = vst [vmem:[#allocation2 + $0xd8] sm:$0xff] %v227_v19  ;;  %v156_v22 = vadd.f32 %v155_v20, %v396_v24  ;;  %v229_v23 = vadd.f32 %v228_v21, %v398_v25 }
  0xe4   :  { %v157_v28 = vpop.f32.mrf.mxu0  ;;  %v230_v29 = vpop.f32.mrf.mxu1 }
  0xe5   :  { %261 = vst [vmem:[#allocation2 + $0xe0] sm:$0xff] %v156_v22  ;;  %263 = vst [vmem:[#allocation2 + $0xf0] sm:$0xff] %v229_v23  ;;  %v158_v30 = vadd.f32 %v157_v28, %v400_v26  ;;  %v231_v31 = vadd.f32 %v230_v29, %v402_v27 }
  0xe7   :  { %262 = vst [vmem:[#allocation2 + $0xe8] sm:$0xff] %v158_v30  ;;  %264 = vst [vmem:[#allocation2 + $0xf8] sm:$0xff] %v231_v31 }
  0xe8   :  { %314 = shalt.err (!%p311_p4)
}
  0xe9   :  { %s327_s11 = smov 512   ;;  %s328_s12 = smov 32  }
  0xea   :  { %276 = dma.vmem_to_hbm [thread:$0]  %s271_s2, 4096, %s442_s3, [#allocation3], %s327_s11, %s327_s11, %s328_s12  }
  0xeb   :  { %323 = dma.done.wait [#allocation3], 4096  }
  0xec   :  { %324 = vsyncadd [#allocation3], 4294963200 }
  0xed   :  { %280 = vsyncpa [#allocation3], 1 }

</bundles_post_ra>
